<compile_context>
chip_gen: v7x
topology: tpu7x:2x2x1
jax: 0.10.0
libtpu: 0.0.40
codegen_flags: <defaults>
</compile_context>

<pallas_src>
import functools

import jax
import jax.numpy as jnp
from jax.experimental import pallas as pl
from jax.experimental.pallas import tpu as pltpu


def _cdiv(a: int, b: int) -> int:
    return -(-a // b)


def _round_up(a: int, m: int) -> int:
    return _cdiv(a, m) * m


def _accum_lane_folds(x_ref, acc_ref, *, valid_lanes: int):
    """Fold the first `valid_lanes` lanes of x_ref into the (tile_r, 128) f32 acc.

    Uses static, 128-lane-aligned slices (pure VALU adds, layout friendly).
    Only the single partial 128-lane chunk (if any) is masked.
    """
    full = valid_lanes // 128
    tail = valid_lanes - full * 128
    partial = None
    for k in range(full):
        chunk = x_ref[:, k * 128:(k + 1) * 128].astype(jnp.float32)
        partial = chunk if partial is None else partial + chunk
    if tail:
        chunk = x_ref[:, full * 128:(full + 1) * 128].astype(jnp.float32)
        lane = jax.lax.broadcasted_iota(jnp.int32, (1, 128), 1)
        chunk = jnp.where(lane < tail, chunk, 0.0)
        partial = chunk if partial is None else partial + chunk
    acc_ref[...] += partial


def _gap1d_reduce_kernel(x_ref, o_ref, acc_ref, *, tile_l: int, l_total: int):
    """Multi L-block path: lane-dense f32 accumulator resident across the L axis."""
    j = pl.program_id(1)
    nj = pl.num_programs(1)
    rem = l_total % tile_l  # 0 if L divides evenly into tiles

    @pl.when(j == 0)
    def _init():
        acc_ref[...] = jnp.zeros_like(acc_ref)

    if rem == 0:
        # No ragged tail: same unmasked accumulate every step.
        _accum_lane_folds(x_ref, acc_ref, valid_lanes=tile_l)
    else:
        # Steady state: full, unmasked tiles.
        @pl.when(j < nj - 1)
        def _steady():
            _accum_lane_folds(x_ref, acc_ref, valid_lanes=tile_l)

        # Only the last L step sees (and masks) the ragged tail.
        @pl.when(j == nj - 1)
        def _last():
            _accum_lane_folds(x_ref, acc_ref, valid_lanes=rem)

    @pl.when(j == nj - 1)
    def _finalize():
        # Single cross-lane (XLU) reduce per row tile, then scale.
        row_sum = jnp.sum(acc_ref[...], axis=-1, keepdims=True)
        o_ref[...] = (row_sum * (1.0 / l_total)).astype(o_ref.dtype)


def _gap1d_single_kernel(x_ref, o_ref, *, l_total: int):
    """Single L-block path: reduce the whole (possibly ragged) row in one shot."""
    x = x_ref[...].astype(jnp.float32)
    o_ref[...] = (jnp.sum(x, axis=-1, keepdims=True) * (1.0 / l_total)).astype(o_ref.dtype)


def gap1d(x: jax.Array, output_size: int = 1, *, block_bytes: int = 4 * 1024 * 1024) -> jax.Array:
    """Pallas equivalent of GAP1d(output_size).forward(x) for x of shape (N, C, L).

    block_bytes: target bytes per pipelined input block.  4 MiB is safe on all
    generations; on v6e/v7x 8-16 MiB can be passed (vmem_limit_bytes is raised
    automatically).
    """
    if output_size != 1:
        # TODO(synk): general AdaptiveAvgPool1d(output_size > 1) binning is not implemented.
        raise NotImplementedError("gap1d only supports output_size=1 (global average pooling)")

    n, c, l = x.shape
    r = n * c
    itemsize = jnp.dtype(x.dtype).itemsize

    # Tiny-L fallback: each HBM row would be a sub-512 B strided DMA — let XLA do it.
    if l * itemsize < 512:
        return jnp.mean(x.astype(jnp.float32), axis=-1).astype(x.dtype).reshape(n, c * output_size)

    x2 = x.reshape(r, l)

    # Row tile: multiple of 8 sublanes, and >= 2 blocks whenever R > 8 so the
    # "parallel" row axis can be sharded across v7x's two TensorCores.
    if r <= 8:
        tile_r = r
    else:
        tile_r = min(512, _round_up(_cdiv(r, 2), 8))

    # Lane tile: dtype-aware so each pipelined block is ~block_bytes of real
    # bytes; multiple of 128 lanes; capped to bound the unrolled fold count.
    tile_l_cap = block_bytes // (tile_r * itemsize)
    tile_l_cap = max(128, min(8192, (tile_l_cap // 128) * 128))
    single_block = l <= tile_l_cap
    tile_l = l if single_block else tile_l_cap

    grid_r = _cdiv(r, tile_r)
    out_shape = jax.ShapeDtypeStruct((r, 1), x.dtype)
    cost = pl.CostEstimate(
        flops=r * l,
        transcendentals=0,
        bytes_accessed=r * l * itemsize + r * itemsize,
    )

    # Raise the scoped-VMEM limit only when larger (v6e/v7x) tiles were requested.
    block_in_bytes = tile_r * tile_l * itemsize
    vmem_limit = None
    if block_in_bytes > 4 * 1024 * 1024:
        vmem_limit = min(3 * block_in_bytes + tile_r * 128 * 4 + (1 << 20), 60 * 1024 * 1024)

    if single_block:
        out = pl.pallas_call(
            functools.partial(_gap1d_single_kernel, l_total=l),
            out_shape=out_shape,
            grid=(grid_r,),
            in_specs=[pl.BlockSpec((tile_r, l), lambda i: (i, 0))],
            out_specs=pl.BlockSpec((tile_r, 1), lambda i: (i, 0)),
            compiler_params=pltpu.CompilerParams(
                dimension_semantics=("parallel",),
                vmem_limit_bytes=vmem_limit,
            ),
            cost_estimate=cost,
        )(x2)
    else:
        grid_l = _cdiv(l, tile_l)
        out = pl.pallas_call(
            functools.partial(_gap1d_reduce_kernel, tile_l=tile_l, l_total=l),
            out_shape=out_shape,
            grid_spec=pltpu.PrefetchScalarGridSpec(
                num_scalar_prefetch=0,
                grid=(grid_r, grid_l),
                in_specs=[pl.BlockSpec((tile_r, tile_l), lambda i, j: (i, j))],
                out_specs=pl.BlockSpec((tile_r, 1), lambda i, j: (i, 0)),
                scratch_shapes=[pltpu.VMEM((tile_r, 128), jnp.float32)],
            ),
            compiler_params=pltpu.CompilerParams(
                dimension_semantics=("parallel", "arbitrary"),
                vmem_limit_bytes=vmem_limit,
            ),
            cost_estimate=cost,
        )(x2)

    return out.reshape(n, c * output_size)


if __name__ == "__main__":
    key = jax.random.PRNGKey(0)
    k1, k2, k3 = jax.random.split(key, 3)

    def ref_gap1d(x):
        return jnp.mean(x.astype(jnp.float32), axis=-1).astype(x.dtype)

    # Case 1: single L-block kernel path with an L that is NOT a multiple of 128
    # (validates masked lane reduction over the ragged block on real hardware).
    x1 = jax.random.normal(k1, (2, 4, 300), dtype=jnp.float32)
    o1 = gap1d(x1)

    # Case 2: multi L-block kernel path with a ragged tail and 2 parallel row
    # blocks (small block_bytes keeps shapes tiny while exercising the full
    # init / steady-state / masked-tail / finalize pipeline).
    x2 = jax.random.normal(k2, (2, 8, 1000), dtype=jnp.float32)
    o2 = gap1d(x2, block_bytes=16 * 1024)

    # Case 3: tiny-L fallback path (the original PyTorch-style small shape).
    x3 = jax.random.normal(k3, (2, 4, 16), dtype=jnp.float32)
    o3 = gap1d(x3)

    jax.block_until_ready((o1, o2, o3))

    for o, x in ((o1, x1), (o2, x2), (o3, x3)):
        expect = ref_gap1d(x)
        assert o.shape == (x.shape[0], x.shape[1]), o.shape
        assert o.dtype == x.dtype
        assert jnp.allclose(o, expect, rtol=1e-5, atol=1e-5), "mismatch vs reference mean"

    print("KERNEL_OK")
</pallas_src>

<mosaic_0001>
module attributes {stable_mosaic.version = 11 : i64} {
  func.func @_gap1d_single_kernel(%arg0: i32, %arg1: memref<8x300xf32, #tpu.memory_space<vmem>>, %arg2: memref<8x1xf32, #tpu.memory_space<vmem>>) attributes {dimension_semantics = [#tpu.dimension_semantics<parallel>], iteration_bounds = array<i64: 1>, scalar_prefetch = 0 : i64, scratch_operands = 0 : i64, tpu.core_type = #tpu.core_type<tc>, window_params = [{transform_indices = @transform_0, window_bounds = array<i64: 8, 300>}, {transform_indices = @transform_1, window_bounds = array<i64: 8, 1>}]} {
    %c0 = arith.constant 0 : index
    %c0_0 = arith.constant 0 : index
    %0 = vector.load %arg1[%c0, %c0_0] : memref<8x300xf32, #tpu.memory_space<vmem>>, vector<8x300xf32>
    %cst = arith.constant dense<0.000000e+00> : vector<8xf32>
    %1 = vector.multi_reduction <add>, %0, %cst [1] : vector<8x300xf32> to vector<8xf32>
    %2 = vector.shape_cast %1 : vector<8xf32> to vector<8x1xf32>
    %cst_1 = arith.constant 0.00333333341 : f32
    %3 = vector.broadcast %cst_1 : f32 to vector<8x1xf32>
    %4 = arith.mulf %2, %3 : vector<8x1xf32>
    %c0_2 = arith.constant 0 : index
    %c0_3 = arith.constant 0 : index
    %5 = vector.load %arg2[%c0_2, %c0_3] : memref<8x1xf32, #tpu.memory_space<vmem>>, vector<8x1xf32>
    tpu.vector_store %arg2[%c0_2, %c0_3], %4 {strides = array<i32>} : memref<8x1xf32, #tpu.memory_space<vmem>>, vector<8x1xf32>,
    return
  }
  func.func @transform_0(%arg0: i32) -> (i32, i32) {
    %c0_i32 = arith.constant 0 : i32
    %c0_i32_0 = arith.constant 0 : i32
    return %arg0, %c0_i32 : i32, i32
  }
  func.func @transform_1(%arg0: i32) -> (i32, i32) {
    %c0_i32 = arith.constant 0 : i32
    %c0_i32_0 = arith.constant 0 : i32
    return %arg0, %c0_i32 : i32, i32
  }
}

</mosaic_0001>

<bundles_post_ra>
// kernel: tpu_custom_call.1
= control target key start
LH: loop header
LB: loop body
LE: loop exit
PB: predicated region body
PF: predicated region fallthrough
CT: control target
= control target key end

     0   :  { %6 = vsyncpa [#allocation3], 0  ;;  %s62_s6 = smov [#allocation2]   ;;  %s88_s0 = inlined_call_operand.hbm [shape: f32[8,300], index: 0, kind: input, shape index: {}]   ;;  %s89_s1 = inlined_call_operand.vmem [shape: f32[8,1], index: 1, kind: output, shape index: {}]  }
   0x1   :  { %s13_s7 = sshll.u32 %s62_s6, 4  ;;  %s38_s10 = scalar_lea.hbm %s88_s0, 384  ;;  %s14_s7 = int_to_ptr.vmem [resolvable:$true] %s13_s7 }
   0x2   :  { %p39_p0 = scmp.ne.s32.totalorder %s88_s0, %s38_s10  ;;  %p42_p1 = scmp.lt.u32.totalorder %s38_s10, %s88_s0 }
   0x4   :  { %p44_p2 = pnand %p42_p1, %p39_p0 }
   0x6   :  { %47 = shalt.err (!%p44_p2)
}
   0x7   :  { %s48_s15 = scalar_lea.vmem %s14_s7, 384  ;;  %p53_p4 = scmp.lt.s32.totalorder %s14_s7, %s14_s7 }
   0x8   :  { %p49_p3 = scmp.ne.s32.totalorder %s14_s7, %s48_s15  ;;  %p54_p5 = scmp.lt.s32.totalorder %s48_s15, %s48_s15 }
   0xa   :  { %p55_p6 = por %p54_p5, %p53_p4 }
   0xc   :  { %p56_p7 = pnand %p55_p6, %p49_p3 }
   0xe   :  { %59 = shalt.err (!%p56_p7)
}
   0xf   :  { %16 = dma.hbm_to_vmem [thread:$0]  %s88_s0, 384, %s14_s7, [#allocation3]  }
  0x10   :  { %60 = dma.done.wait [#allocation3], 384  }
  0x11   :  { %61 = vsyncadd [#allocation3], 4294966912  ;;  %vm24_vm0 = vcmask 359424   ;;  %v20_v0 = vld [vmem:[#allocation2] sm:$0xff]  ;;  %v21_v1 = vld [vmem:[#allocation2 + $0x8] sm:$0xff]  ;;  %vm30_vm1 = vcmask 7168  }
  0x12   :  { %v22_v2 = vld [vmem:[#allocation2 + $0x10] sm:$0xff]  ;;  %v23_v3 = vadd.f32 %v21_v1, %v20_v0 }
  0x13   :  { %v25_v4 = vsel %vm24_vm0, %v22_v2, 0.0 }
  0x14   :  { %v26_v5 = vadd.f32 %v25_v4, %v23_v3 }
  0x16   :  { %27 = vadd.xlane.f32.xlu0 %v26_v5 }
  0xa3   :  { %v28_v6 = vpop.xlane.xlu0 %27 }
  0xa4   :  { %v29_v7 = vmul.f32 0.0033333334, %v28_v6 }
  0xa6   :  { %31 = vst.msk [vmem:[%s89_s1] sm:$0xff] %vm30_vm1, %v29_v7 }
  0xa7   :  { %36 = vsyncpa [#allocation3], 1 }

</bundles_post_ra>
